<compile_context>
chip_gen: v6e
topology: v6e:2x2x1
jax: 0.10.0
libtpu: 0.0.40
codegen_flags: <defaults>
</compile_context>

<pallas_src>
import jax
import jax.numpy as jnp
from jax.experimental import pallas as pl
from jax.experimental.pallas import tpu as pltpu


def _round_up(n, m):
    return ((n + m - 1) // m) * m


def _padded_vmem_bytes(shape, dtype):
    """Bytes a block actually occupies in VMEM after (sublane, 128-lane) padding."""
    itemsize = jnp.dtype(dtype).itemsize
    sub_mult = 8 * max(1, 4 // itemsize)         # 8 sublanes f32, 16 bf16, 32 int8
    lead = 1
    for d in shape[:-2]:
        lead *= int(d)
    sub = int(shape[-2]) if len(shape) >= 2 else 1
    lane = int(shape[-1])
    return lead * _round_up(sub, sub_mult) * _round_up(lane, 128) * itemsize


def _autoencoder_kernel(x_ref,
                        w1_ref, b1_ref,
                        w2_ref, b2_ref,
                        w3_ref, b3_ref,
                        w4_ref, b4_ref,
                        out_ref):
    """enc(Linear->ReLU->Linear->ReLU) + dec(Linear->ReLU->Linear->Sigmoid) on one
    lane-packed batch tile. Weights are VMEM-resident; x/out tiles stream and
    double-buffer. All accumulation and elementwise math is f32."""
    x = x_ref[...].astype(w1_ref.dtype)          # operand cast in-kernel (no wrapper pass)

    h = jnp.dot(x, w1_ref[...], preferred_element_type=jnp.float32) + b1_ref[...]
    h = jnp.maximum(h, 0.0)

    z = jnp.dot(h.astype(w2_ref.dtype), w2_ref[...],
                preferred_element_type=jnp.float32) + b2_ref[...]
    z = jnp.maximum(z, 0.0)

    d = jnp.dot(z.astype(w3_ref.dtype), w3_ref[...],
                preferred_element_type=jnp.float32) + b3_ref[...]
    d = jnp.maximum(d, 0.0)

    y = jnp.dot(d.astype(w4_ref.dtype), w4_ref[...],
                preferred_element_type=jnp.float32) + b4_ref[...]
    out_ref[...] = jax.nn.sigmoid(y).astype(out_ref.dtype)


def bollinger_autoencoder_forward(x, params, *, block_batch=2048,
                                  compute_dtype=jnp.float32, out_dtype=None):
    """x: [batch, input_dim]; params: w1..w4 ([in, out]) and b1..b4 ([1, out]).

    block_batch: target batch tile size in *original* rows (large tiles amortize
    the ~0.35 us per-grid-step overhead). compute_dtype: MXU operand dtype
    (f32 default, v5e-safe; bf16 on v6e/v7x). out_dtype: output dtype (defaults
    to x.dtype; bf16 halves output writeback traffic).
    """
    batch, input_dim = x.shape
    hidden_dim = params["w1"].shape[1]
    bottleneck_dim = params["w2"].shape[1]
    out_dtype = x.dtype if out_dtype is None else out_dtype

    # --- lane packing: fold `pack` batch rows into one (up to) 128-lane row -----
    max_pack = max(1, 128 // input_dim)
    pack = 1
    for p in range(max_pack, 0, -1):
        if batch % p == 0:
            pack = p
            break
    lane_w = input_dim * pack
    bp = batch // pack                           # packed batch rows

    def pack_w(w):                               # block-diagonal replication (exact math)
        return w if pack == 1 else jnp.kron(jnp.eye(pack, dtype=w.dtype), w)

    def pack_b(b):
        return b if pack == 1 else jnp.tile(b, (1, pack))

    ws = [pack_w(params[f"w{i}"]).astype(compute_dtype) for i in range(1, 5)]
    bs = [pack_b(params[f"b{i}"]).astype(jnp.float32) for i in range(1, 5)]

    # Packed view of x: free contiguous reshape; no pad/astype/slice HBM passes.
    xp = x.reshape(bp, lane_w)

    # --- batch tile: large, balanced across steps, >=2 grid steps when possible ---
    tb_target = max(8, block_batch // pack)
    n_steps = pl.cdiv(bp, tb_target)
    if n_steps < 2 and bp >= 16:
        n_steps = 2                              # keep both v7x TensorCores busy
    tb = _round_up(pl.cdiv(bp, n_steps), 8)
    if tb >= bp:
        tb = bp                                  # single exact block (tiny batches)
    grid = (pl.cdiv(bp, tb),)                    # ragged tail handled by Pallas

    x_spec = pl.BlockSpec((tb, lane_w), lambda i: (i, 0))
    out_spec = pl.BlockSpec((tb, lane_w), lambda i: (i, 0))

    def resident(arr):
        # Full array with a constant index_map -> DMA'd once, VMEM-resident.
        return pl.BlockSpec(arr.shape, lambda i: (0, 0))

    # --- advisory cost estimate (packed / actually-computed sizes) ---------------
    rows = grid[0] * tb                          # packed rows processed (incl. tail pad)
    layer_kn = [(lane_w, hidden_dim * pack),
                (hidden_dim * pack, bottleneck_dim * pack),
                (bottleneck_dim * pack, hidden_dim * pack),
                (hidden_dim * pack, lane_w)]
    flops = 2 * rows * sum(k * n for k, n in layer_kn)
    transcendentals = rows * lane_w              # sigmoid exps
    param_bytes = sum(int(a.size) * jnp.dtype(a.dtype).itemsize for a in ws + bs)
    bytes_accessed = (rows * lane_w * jnp.dtype(x.dtype).itemsize
                      + rows * lane_w * jnp.dtype(out_dtype).itemsize
                      + param_bytes)

    # --- VMEM budget with real (lane/sublane-padded) block footprints -------------
    max_lane = max(lane_w, hidden_dim * pack, bottleneck_dim * pack)
    stream_bytes = (2 * _padded_vmem_bytes((tb, lane_w), x.dtype)        # x double-buffer
                    + 2 * _padded_vmem_bytes((tb, lane_w), out_dtype))   # out double-buffer
    resident_bytes = 2 * sum(_padded_vmem_bytes(a.shape, a.dtype) for a in ws + bs)
    act_bytes = 6 * _padded_vmem_bytes((tb, max_lane), jnp.float32)      # in-flight f32
    vmem_limit = int(min(max(int(1.5 * (stream_bytes + resident_bytes + act_bytes)),
                             8 << 20), 48 << 20))                        # safe under v7x 64 MiB

    out_p = pl.pallas_call(
        _autoencoder_kernel,
        out_shape=jax.ShapeDtypeStruct((bp, lane_w), out_dtype),
        grid_spec=pltpu.PrefetchScalarGridSpec(
            num_scalar_prefetch=0,
            grid=grid,
            in_specs=[x_spec,
                      resident(ws[0]), resident(bs[0]),
                      resident(ws[1]), resident(bs[1]),
                      resident(ws[2]), resident(bs[2]),
                      resident(ws[3]), resident(bs[3])],
            out_specs=out_spec),
        compiler_params=pltpu.CompilerParams(
            dimension_semantics=("parallel",),
            vmem_limit_bytes=vmem_limit),
        cost_estimate=pl.CostEstimate(flops=int(flops),
                                      transcendentals=int(transcendentals),
                                      bytes_accessed=int(bytes_accessed)),
    )(xp, ws[0], bs[0], ws[1], bs[1], ws[2], bs[2], ws[3], bs[3])

    # Free contiguous reshape back to [batch, input_dim]; no slice needed.
    return out_p.reshape(batch, input_dim)


def init_params(key, input_dim, encoding_dim_factor=0.5):
    """hidden = int(input_dim*0.75); bottleneck = int(input_dim*factor).
    PyTorch-style uniform(-1/sqrt(fan_in), 1/sqrt(fan_in)); weights [in, out], biases [1, out]."""
    hidden_dim = int(input_dim * 0.75)
    bottleneck_dim = int(input_dim * encoding_dim_factor)

    dims = [(input_dim, hidden_dim),
            (hidden_dim, bottleneck_dim),
            (bottleneck_dim, hidden_dim),
            (hidden_dim, input_dim)]

    params = {}
    keys = jax.random.split(key, 2 * len(dims))
    for idx, (fan_in, fan_out) in enumerate(dims):
        bound = 1.0 / (fan_in ** 0.5)
        params[f"w{idx + 1}"] = jax.random.uniform(
            keys[2 * idx], (fan_in, fan_out),
            minval=-bound, maxval=bound, dtype=jnp.float32)
        params[f"b{idx + 1}"] = jax.random.uniform(
            keys[2 * idx + 1], (1, fan_out),
            minval=-bound, maxval=bound, dtype=jnp.float32)
    return params


def reference_forward(x, params):
    """Pure-JAX f32 reference."""
    h = jnp.maximum(x @ params["w1"] + params["b1"], 0.0)
    z = jnp.maximum(h @ params["w2"] + params["b2"], 0.0)
    d = jnp.maximum(z @ params["w3"] + params["b3"], 0.0)
    return jax.nn.sigmoid(d @ params["w4"] + params["b4"])


if __name__ == "__main__":
    key = jax.random.PRNGKey(0)
    k_params, k_x, k_params_odd, k_x_odd = jax.random.split(key, 4)

    # Main config: batch=260, input_dim=32 (hidden=24, bottleneck=16).
    # pack=4 -> 65 packed rows of 128 lanes, 2 parallel grid steps (v7x megacore),
    # ragged tail block handled by Pallas (no pad/slice/astype wrapper passes).
    batch, input_dim = 260, 32
    params = init_params(k_params, input_dim, encoding_dim_factor=0.5)
    x = jax.random.normal(k_x, (batch, input_dim), dtype=jnp.float32)
    ref = reference_forward(x, params)

    # f32 path (exact semantics).
    out = jax.block_until_ready(bollinger_autoencoder_forward(x, params))
    assert out.shape == (batch, input_dim)
    assert out.dtype == jnp.float32
    assert jnp.allclose(out, ref, atol=1e-5, rtol=1e-5), "f32 mismatch vs reference"

    # bf16 output writeback (halves output HBM traffic); f32 accumulation inside.
    out_b16 = jax.block_until_ready(
        bollinger_autoencoder_forward(x, params, out_dtype=jnp.bfloat16))
    assert out_b16.dtype == jnp.bfloat16
    assert jnp.allclose(out_b16.astype(jnp.float32), ref, atol=1e-2, rtol=1e-2), \
        "bf16-output mismatch vs reference"

    # bf16 MXU operand path (v6e/v7x); cast happens in-kernel, accumulation stays f32.
    out_bf = jax.block_until_ready(
        bollinger_autoencoder_forward(x, params, compute_dtype=jnp.bfloat16))
    assert jnp.allclose(out_bf, ref, atol=3e-2, rtol=3e-2), "bf16-operand mismatch"

    # Odd dims (input_dim=30 -> hidden=22, bottleneck=15), tiny batch: single exact
    # block, non-multiple-of-8/128 feature widths (Mosaic pads internally).
    params_odd = init_params(k_params_odd, 30, encoding_dim_factor=0.5)
    x_odd = jax.random.normal(k_x_odd, (12, 30), dtype=jnp.float32)
    out_odd = jax.block_until_ready(bollinger_autoencoder_forward(x_odd, params_odd))
    ref_odd = reference_forward(x_odd, params_odd)
    assert jnp.allclose(out_odd, ref_odd, atol=1e-5, rtol=1e-5), "odd-dim mismatch"

    print("KERNEL_OK")
</pallas_src>

<mosaic_0001>
module attributes {stable_mosaic.version = 11 : i64} {
  func.func @_autoencoder_kernel(%arg0: i32, %arg1: memref<40x128xf32, #tpu.memory_space<vmem>>, %arg2: memref<128x96xf32, #tpu.memory_space<vmem>>, %arg3: memref<1x96xf32, #tpu.memory_space<vmem>>, %arg4: memref<96x64xf32, #tpu.memory_space<vmem>>, %arg5: memref<1x64xf32, #tpu.memory_space<vmem>>, %arg6: memref<64x96xf32, #tpu.memory_space<vmem>>, %arg7: memref<1x96xf32, #tpu.memory_space<vmem>>, %arg8: memref<96x128xf32, #tpu.memory_space<vmem>>, %arg9: memref<1x128xf32, #tpu.memory_space<vmem>>, %arg10: memref<40x128xf32, #tpu.memory_space<vmem>>) attributes {dimension_semantics = [#tpu.dimension_semantics<parallel>], iteration_bounds = array<i64: 2>, scalar_prefetch = 0 : i64, scratch_operands = 0 : i64, tpu.core_type = #tpu.core_type<tc>, window_params = [{transform_indices = @transform_0, window_bounds = array<i64: 40, 128>}, {pipeline_mode = #tpu.pipeline_mode<synchronous>, transform_indices = @transform_1, window_bounds = array<i64: 128, 96>}, {pipeline_mode = #tpu.pipeline_mode<synchronous>, transform_indices = @transform_2, window_bounds = array<i64: 1, 96>}, {pipeline_mode = #tpu.pipeline_mode<synchronous>, transform_indices = @transform_3, window_bounds = array<i64: 96, 64>}, {pipeline_mode = #tpu.pipeline_mode<synchronous>, transform_indices = @transform_4, window_bounds = array<i64: 1, 64>}, {pipeline_mode = #tpu.pipeline_mode<synchronous>, transform_indices = @transform_5, window_bounds = array<i64: 64, 96>}, {pipeline_mode = #tpu.pipeline_mode<synchronous>, transform_indices = @transform_6, window_bounds = array<i64: 1, 96>}, {pipeline_mode = #tpu.pipeline_mode<synchronous>, transform_indices = @transform_7, window_bounds = array<i64: 96, 128>}, {pipeline_mode = #tpu.pipeline_mode<synchronous>, transform_indices = @transform_8, window_bounds = array<i64: 1, 128>}, {transform_indices = @transform_9, window_bounds = array<i64: 40, 128>}]} {
    %c0 = arith.constant 0 : index
    %c0_0 = arith.constant 0 : index
    %0 = vector.load %arg1[%c0, %c0_0] : memref<40x128xf32, #tpu.memory_space<vmem>>, vector<40x128xf32>
    %c0_1 = arith.constant 0 : index
    %c0_2 = arith.constant 0 : index
    %1 = vector.load %arg2[%c0_1, %c0_2] : memref<128x96xf32, #tpu.memory_space<vmem>>, vector<128x96xf32>
    %cst = arith.constant dense<0.000000e+00> : vector<40x96xf32>
    %2 = tpu.matmul %0, %1, %cst {dimension_numbers = #tpu.dot_dimension_numbers<[1], [0], [0], [1], [0, 0, 1, 1], [], []>} : vector<40x128xf32>, vector<128x96xf32>, vector<40x96xf32> -> vector<40x96xf32>
    %c0_3 = arith.constant 0 : index
    %c0_4 = arith.constant 0 : index
    %3 = vector.load %arg3[%c0_3, %c0_4] : memref<1x96xf32, #tpu.memory_space<vmem>>, vector<1x96xf32>
    %4 = vector.broadcast %3 : vector<1x96xf32> to vector<40x96xf32>
    %5 = arith.addf %2, %4 : vector<40x96xf32>
    %cst_5 = arith.constant 0.000000e+00 : f32
    %6 = vector.broadcast %cst_5 : f32 to vector<40x96xf32>
    %7 = arith.maximumf %5, %6 : vector<40x96xf32>
    %c0_6 = arith.constant 0 : index
    %c0_7 = arith.constant 0 : index
    %8 = vector.load %arg4[%c0_6, %c0_7] : memref<96x64xf32, #tpu.memory_space<vmem>>, vector<96x64xf32>
    %cst_8 = arith.constant dense<0.000000e+00> : vector<40x64xf32>
    %9 = tpu.matmul %7, %8, %cst_8 {dimension_numbers = #tpu.dot_dimension_numbers<[1], [0], [0], [1], [0, 0, 1, 1], [], []>} : vector<40x96xf32>, vector<96x64xf32>, vector<40x64xf32> -> vector<40x64xf32>
    %c0_9 = arith.constant 0 : index
    %c0_10 = arith.constant 0 : index
    %10 = vector.load %arg5[%c0_9, %c0_10] : memref<1x64xf32, #tpu.memory_space<vmem>>, vector<1x64xf32>
    %11 = vector.broadcast %10 : vector<1x64xf32> to vector<40x64xf32>
    %12 = arith.addf %9, %11 : vector<40x64xf32>
    %cst_11 = arith.constant 0.000000e+00 : f32
    %13 = vector.broadcast %cst_11 : f32 to vector<40x64xf32>
    %14 = arith.maximumf %12, %13 : vector<40x64xf32>
    %c0_12 = arith.constant 0 : index
    %c0_13 = arith.constant 0 : index
    %15 = vector.load %arg6[%c0_12, %c0_13] : memref<64x96xf32, #tpu.memory_space<vmem>>, vector<64x96xf32>
    %cst_14 = arith.constant dense<0.000000e+00> : vector<40x96xf32>
    %16 = tpu.matmul %14, %15, %cst_14 {dimension_numbers = #tpu.dot_dimension_numbers<[1], [0], [0], [1], [0, 0, 1, 1], [], []>} : vector<40x64xf32>, vector<64x96xf32>, vector<40x96xf32> -> vector<40x96xf32>
    %c0_15 = arith.constant 0 : index
    %c0_16 = arith.constant 0 : index
    %17 = vector.load %arg7[%c0_15, %c0_16] : memref<1x96xf32, #tpu.memory_space<vmem>>, vector<1x96xf32>
    %18 = vector.broadcast %17 : vector<1x96xf32> to vector<40x96xf32>
    %19 = arith.addf %16, %18 : vector<40x96xf32>
    %cst_17 = arith.constant 0.000000e+00 : f32
    %20 = vector.broadcast %cst_17 : f32 to vector<40x96xf32>
    %21 = arith.maximumf %19, %20 : vector<40x96xf32>
    %c0_18 = arith.constant 0 : index
    %c0_19 = arith.constant 0 : index
    %22 = vector.load %arg8[%c0_18, %c0_19] : memref<96x128xf32, #tpu.memory_space<vmem>>, vector<96x128xf32>
    %cst_20 = arith.constant dense<0.000000e+00> : vector<40x128xf32>
    %23 = tpu.matmul %21, %22, %cst_20 {dimension_numbers = #tpu.dot_dimension_numbers<[1], [0], [0], [1], [0, 0, 1, 1], [], []>} : vector<40x96xf32>, vector<96x128xf32>, vector<40x128xf32> -> vector<40x128xf32>
    %c0_21 = arith.constant 0 : index
    %c0_22 = arith.constant 0 : index
    %24 = vector.load %arg9[%c0_21, %c0_22] : memref<1x128xf32, #tpu.memory_space<vmem>>, vector<1x128xf32>
    %25 = vector.broadcast %24 : vector<1x128xf32> to vector<40x128xf32>
    %26 = arith.addf %23, %25 : vector<40x128xf32>
    %27 = arith.negf %26 : vector<40x128xf32>
    %28 = math.exp %27 : vector<40x128xf32>
    %cst_23 = arith.constant 1.000000e+00 : f32
    %29 = vector.broadcast %cst_23 : f32 to vector<40x128xf32>
    %30 = arith.addf %29, %28 : vector<40x128xf32>
    %31 = arith.divf %29, %30 : vector<40x128xf32>
    %c0_24 = arith.constant 0 : index
    %c0_25 = arith.constant 0 : index
    %32 = vector.load %arg10[%c0_24, %c0_25] : memref<40x128xf32, #tpu.memory_space<vmem>>, vector<40x128xf32>
    tpu.vector_store %arg10[%c0_24, %c0_25], %31 {strides = array<i32>} : memref<40x128xf32, #tpu.memory_space<vmem>>, vector<40x128xf32>,
    return
  }
  func.func @transform_0(%arg0: i32) -> (i32, i32) {
    %c0_i32 = arith.constant 0 : i32
    %c0_i32_0 = arith.constant 0 : i32
    return %arg0, %c0_i32 : i32, i32
  }
  func.func @transform_1(%arg0: i32) -> (i32, i32) {
    %c0_i32 = arith.constant 0 : i32
    %c0_i32_0 = arith.constant 0 : i32
    %c0_i32_1 = arith.constant 0 : i32
    return %c0_i32, %c0_i32_0 : i32, i32
  }
  func.func @transform_2(%arg0: i32) -> (i32, i32) {
    %c0_i32 = arith.constant 0 : i32
    %c0_i32_0 = arith.constant 0 : i32
    %c0_i32_1 = arith.constant 0 : i32
    return %c0_i32, %c0_i32_0 : i32, i32
  }
  func.func @transform_3(%arg0: i32) -> (i32, i32) {
    %c0_i32 = arith.constant 0 : i32
    %c0_i32_0 = arith.constant 0 : i32
    %c0_i32_1 = arith.constant 0 : i32
    return %c0_i32, %c0_i32_0 : i32, i32
  }
  func.func @transform_4(%arg0: i32) -> (i32, i32) {
    %c0_i32 = arith.constant 0 : i32
    %c0_i32_0 = arith.constant 0 : i32
    %c0_i32_1 = arith.constant 0 : i32
    return %c0_i32, %c0_i32_0 : i32, i32
  }
  func.func @transform_5(%arg0: i32) -> (i32, i32) {
    %c0_i32 = arith.constant 0 : i32
    %c0_i32_0 = arith.constant 0 : i32
    %c0_i32_1 = arith.constant 0 : i32
    return %c0_i32, %c0_i32_0 : i32, i32
  }
  func.func @transform_6(%arg0: i32) -> (i32, i32) {
    %c0_i32 = arith.constant 0 : i32
    %c0_i32_0 = arith.constant 0 : i32
    %c0_i32_1 = arith.constant 0 : i32
    return %c0_i32, %c0_i32_0 : i32, i32
  }
  func.func @transform_7(%arg0: i32) -> (i32, i32) {
    %c0_i32 = arith.constant 0 : i32
    %c0_i32_0 = arith.constant 0 : i32
    %c0_i32_1 = arith.constant 0 : i32
    return %c0_i32, %c0_i32_0 : i32, i32
  }
  func.func @transform_8(%arg0: i32) -> (i32, i32) {
    %c0_i32 = arith.constant 0 : i32
    %c0_i32_0 = arith.constant 0 : i32
    %c0_i32_1 = arith.constant 0 : i32
    return %c0_i32, %c0_i32_0 : i32, i32
  }
  func.func @transform_9(%arg0: i32) -> (i32, i32) {
    %c0_i32 = arith.constant 0 : i32
    %c0_i32_0 = arith.constant 0 : i32
    return %arg0, %c0_i32 : i32, i32
  }
}

</mosaic_0001>

<bundles_post_ra>
// kernel: tpu_custom_call.1
= control target key start
LH: loop header
LB: loop body
LE: loop exit
PB: predicated region body
PF: predicated region fallthrough
CT: control target
= control target key end

     0   :  { %14 = vsyncpa [#allocation3], 0  ;;  %s1834_s0 = inlined_call_operand.vmem [shape: f32[65,128], index: 0, kind: input, shape index: {}]   ;;  %s1835_s1 = inlined_call_operand.vmem [shape: f32[128,96], index: 1, kind: input, shape index: {}]   ;;  %s1836_s2 = inlined_call_operand.vmem [shape: f32[1,96], index: 2, kind: input, shape index: {}]   ;;  %s1837_s3 = inlined_call_operand.vmem [shape: f32[96,64], index: 3, kind: input, shape index: {}]   ;;  %s1838_s4 = inlined_call_operand.vmem [shape: f32[1,64], index: 4, kind: input, shape index: {}]   ;;  %s1839_s5 = inlined_call_operand.vmem [shape: f32[64,96], index: 5, kind: input, shape index: {}]   ;;  %s1840_s6 = inlined_call_operand.vmem [shape: f32[1,96], index: 6, kind: input, shape index: {}]   ;;  %s1841_s7 = inlined_call_operand.vmem [shape: f32[96,128], index: 7, kind: input, shape index: {}]   ;;  %s1842_s8 = inlined_call_operand.vmem [shape: f32[1,128], index: 8, kind: input, shape index: {}]   ;;  %s1843_s9 = inlined_call_operand.hbm [shape: f32[65,128], index: 9, kind: output, shape index: {}]  }
   0x1   :  { %16 = vsyncpa [#allocation3 + $0x1], 0  ;;  %s1443_s30 = smov 0   ;;  %s1445_s10 = smov 0  }
   0x2   :  { %s1447_s11 = smov 0   ;;  %s1449_s12 = smov 0  }
   0x3 LB: > { %s1464_s13 = sadd.s32 4294967295, %s1386_s12   ;;  %s978_s14 = sadd.s32 4294967294, %s1386_s12   ;;  %s1386_s12 = sphi %s1449_s12, %s1849_s12   ;;  %s1382_s11 = sphi %s1447_s11, %s1848_s11   ;;  %s1378_s10 = sphi %s1445_s10, %s1847_s10   ;;  %s1374_s30 = sphi %s1443_s30, %s1846_s30  }
   0x4   : > { %s1468_s15 = sadd.s32 1, %s1386_s12   ;;  %s223_s16 = sadd.s32 1, %s1382_s11 }
   0x5   : > { %s220_s17 = ssub.s32 %s1386_s12, %s1468_s15  ;;  %p233_p0 = scmp.ne.s32.totalorder %s1382_s11, %s1378_s10 }
   0x6   : > { %p221_p1 = scmp.eq.s32.totalorder %s220_s17, 0  ;;  %p234_p2 = scmp.eq.s32.totalorder %s1464_s13, 1 }
   0x7   : > { %p239_p3 = scmp.ne.s32.totalorder %s1378_s10, %s1374_s30  ;;  %p240_p4 = scmp.eq.s32.totalorder %s978_s14, 1 }
   0x8   : > { %s1479_s18 = scalar_select %p221_p1, %s1382_s11, %s223_s16  }
   0x9   : > { %p1481_p5 = por %p234_p2, %p233_p0  ;;  %p1485_p6 = por %p240_p4, %p239_p3 }
   0xa   : > { %p981_p7 = scmp.ge.s32.totalorder %s1386_s12, 1  ;;  %p299_p8 = scmp.lt.s32.totalorder %s1386_s12, 3 }
   0xc   : > { %p300_p9 = pnand %p981_p7, %p299_p8 }
   0xd   : > { %s1542_s21 = smul.u32 (!%p300_p9), 5, %s1464_s13 }
   0xe   : > { %303 = sbr.rel (%p300_p9) target bundleno = 915 (0x393), region = 56 }
   0xf   : > { %p344_p10 = scmp.lt.s32.totalorder (!%p300_p9), %s1542_s21, 8 }
  0x13   : > { %v378_v0 = vld [vmem:[%s1835_s1 + $0x78] sm:$0xff]  ;;  %v1388_v1 = vmov 0.0   ;;  %v377_v2 = vld [vmem:[%s1835_s1 + $0x70] sm:$0xff]  ;;  %vm1389_vm0 = vmmov 0   ;;  %v376_v3 = vld [vmem:[%s1835_s1 + $0x68] sm:$0xff]  ;;  %s345_s27 = scalar_select %p344_p10, %s1542_s21, 8 }
  0x14   : > { %1083 = vmatprep.subr.mxu0 %v1388_v1  ;;  %1115 = vmatprep.mubr.msk.f32.mxu0 %vm1389_vm0, %v1388_v1  ;;  %v375_v4 = vld [vmem:[%s1835_s1 + $0x60] sm:$0xff]  ;;  %v492_v5 = vld [vmem:[%s1837_s3 + $0x58] sm:$0xff]  ;;  %v491_v6 = vld [vmem:[%s1837_s3 + $0x50] sm:$0xff]  ;;  %vm500_vm1 = vcmask 785408   ;;  %vm626_vm2 = vcmask 523264   ;;  %s905_s23 = ssub.s32 (%p1481_p5), 9, %s1542_s21 }
  0x15   : > { %1084 = vmatpush3.msra.mxu0 %v378_v0  ;;  %1130 = vmatprep.subr.mxu1 %v1388_v1  ;;  %v374_v7 = vld [vmem:[%s1835_s1 + $0x58] sm:$0xff]  ;;  %v490_v8 = vld [vmem:[%s1837_s3 + $0x48] sm:$0xff]  ;;  %v373_v9 = vld [vmem:[%s1835_s1 + $0x50] sm:$0xff]  ;;  %s982_s17 = sshll.u32 %s345_s27, 3  ;;  %p906_p11 = scmp.lt.s32.totalorder (%p1481_p5), %s905_s23, 5 }
  0x16   : > { %1085 = vmatprep.subr.mxu0 %v1388_v1  ;;  %1154 = vmatprep.mubr.msk.f32.mxu1 %vm1389_vm0, %v1388_v1  ;;  %v489_v10 = vld [vmem:[%s1837_s3 + $0x40] sm:$0xff]  ;;  %v372_v11 = vld [vmem:[%s1835_s1 + $0x48] sm:$0xff]  ;;  %v488_v12 = vld [vmem:[%s1837_s3 + $0x38] sm:$0xff]  ;;  %s347_s29 = scalar_lea.vmem %s1834_s0, %s982_s17 }
  0x17   : > { %1086 = vmatpush3.msra.mxu0 %v377_v2  ;;  %1131 = vmatpush3.msra.mxu1 %v492_v5  ;;  %v371_v13 = vld [vmem:[%s1835_s1 + $0x40] sm:$0xff]  ;;  %v487_v14 = vld [vmem:[%s1837_s3 + $0x30] sm:$0xff]  ;;  %v370_v15 = vld [vmem:[%s1835_s1 + $0x38] sm:$0xff] }
  0x18   : > { %1087 = vmatprep.subr.mxu0 %v1388_v1  ;;  %1132 = vmatprep.subr.mxu1 %v1388_v1  ;;  %v486_v16 = vld [vmem:[%s1837_s3 + $0x28] sm:$0xff]  ;;  %v369_v17 = vld [vmem:[%s1835_s1 + $0x30] sm:$0xff]  ;;  %v485_v18 = vld [vmem:[%s1837_s3 + $0x20] sm:$0xff] }
  0x19   : > { %1088 = vmatpush3.msra.mxu0 %v376_v3  ;;  %1133 = vmatpush3.msra.mxu1 %v491_v6  ;;  %v368_v19 = vld [vmem:[%s1835_s1 + $0x28] sm:$0xff]  ;;  %v484_v20 = vld [vmem:[%s1837_s3 + $0x18] sm:$0xff]  ;;  %v367_v21 = vld [vmem:[%s1835_s1 + $0x20] sm:$0xff] }
  0x1a   : > { %1089 = vmatprep.subr.mxu0 %v1388_v1  ;;  %1134 = vmatprep.subr.mxu1 %v1388_v1  ;;  %v366_v22 = vld [vmem:[%s1835_s1 + $0x18] sm:$0xff]  ;;  %v365_v23 = vld [vmem:[%s1835_s1 + $0x10] sm:$0xff]  ;;  %v364_v24 = vld [vmem:[%s1835_s1 + $0x8] sm:$0xff] }
  0x1b   : > { %1090 = vmatpush3.msra.mxu0 %v375_v4  ;;  %1135 = vmatpush3.msra.mxu1 %v490_v8  ;;  %v363_v25 = vld [vmem:[%s1835_s1] sm:$0xff]  ;;  %v359_v27 = vld [vmem:[%s347_s29 + $0x8] sm:$0xff]  ;;  %v360_v28 = vld [vmem:[%s347_s29 + $0x10] sm:$0xff] }
  0x1c   : > { %1091 = vmatprep.subr.mxu0 %v1388_v1  ;;  %1136 = vmatprep.subr.mxu1 %v1388_v1  ;;  %v358_v26 = vld [vmem:[%s347_s29] sm:$0xff]  ;;  %v361_v29 = vld [vmem:[%s347_s29 + $0x18] sm:$0xff]  ;;  %v483_v31 = vld [vmem:[%s1837_s3 + $0x10] sm:$0xff] }
  0x1d   : > { %1092 = vmatpush3.msra.mxu0 %v374_v7  ;;  %1137 = vmatpush3.msra.mxu1 %v489_v10  ;;  %v362_v30 = vld [vmem:[%s347_s29 + $0x20] sm:$0xff]  ;;  %v482_v32 = vld [vmem:[%s1837_s3 + $0x8] sm:$0xff]  ;;  %v618_v39 = vld [vmem:[%s1839_s5 + $0x38] sm:$0xff]  ;;  %s336_s29 = sand.u32 1, %s1378_s10  }
  0x1e   : > { %1093 = vmatprep.subr.mxu0 %v1388_v1  ;;  %1138 = vmatprep.subr.mxu1 %v1388_v1  ;;  %v481_v33 = vld [vmem:[%s1837_s3] sm:$0xff]  ;;  %v617_v42 = vld [vmem:[%s1839_s5 + $0x30] sm:$0xff]  ;;  %v616_v45 = vld [vmem:[%s1839_s5 + $0x28] sm:$0xff]  ;;  %s1263_s16 = smul.u32 40, %s336_s29  ;;  %s1775_s22 = scalar_lea.sflag [#allocation3], %s336_s29 }
  0x1f   : > { %1094 = vmatpush3.msra.mxu0 %v373_v9  ;;  %1139 = vmatpush3.msra.mxu1 %v488_v12  ;;  %v983_v34 = vld [vmem:[%s1836_s2] ss:$0 sm:$0xff]  ;;  %v614_v51 = vld [vmem:[%s1839_s5 + $0x18] sm:$0xff]  ;;  %v613_v54 = vld [vmem:[%s1839_s5 + $0x10] sm:$0xff] }
  0x20   : > { %1095 = vmatprep.subr.mxu0 %v1388_v1  ;;  %1140 = vmatprep.subr.mxu1 %v1388_v1  ;;  %v615_v48 = vld [vmem:[%s1839_s5 + $0x20] sm:$0xff]  ;;  %v612_v61 = vld [vmem:[%s1839_s5 + $0x8] sm:$0xff]  ;;  %v748_v63 = vld [vmem:[%s1841_s7 + $0x58] sm:$0xff]  ;;  %s338_s17 = scalar_lea.vmem [#allocation2], %s1263_s16 }
  0x21   : > { %1096 = vmatpush3.msra.mxu0 %v372_v11  ;;  %1141 = vmatpush3.msra.mxu1 %v487_v14  ;;  %v611_v62 = vld [vmem:[%s1839_s5] sm:$0xff]  ;;  %v747_v0 = vld [vmem:[%s1841_s7 + $0x50] sm:$0xff]  ;;  %v746_v2 = vld [vmem:[%s1841_s7 + $0x48] sm:$0xff] }
  0x22   : > { %1097 = vmatprep.subr.mxu0 %v1388_v1  ;;  %1142 = vmatprep.subr.mxu1 %v1388_v1  ;;  %v745_v3 = vld [vmem:[%s1841_s7 + $0x40] sm:$0xff]  ;;  %v744_v4 = vld [vmem:[%s1841_s7 + $0x38] sm:$0xff]  ;;  %v743_v5 = vld [vmem:[%s1841_s7 + $0x30] sm:$0xff] }
  0x23   : > { %1098 = vmatpush3.msra.mxu0 %v371_v13  ;;  %1143 = vmatpush3.msra.mxu1 %v486_v16  ;;  %v742_v6 = vld [vmem:[%s1841_s7 + $0x28] sm:$0xff]  ;;  %v741_v7 = vld [vmem:[%s1841_s7 + $0x20] sm:$0xff]  ;;  %v740_v8 = vld [vmem:[%s1841_s7 + $0x18] sm:$0xff] }
  0x24   : > { %1099 = vmatprep.subr.mxu0 %v1388_v1  ;;  %1144 = vmatprep.subr.mxu1 %v1388_v1  ;;  %v984_v9 = vld [vmem:[%s1838_s4] ss:$0 sm:$0xff] }
  0x25   : > { %1100 = vmatpush3.msra.mxu0 %v370_v15  ;;  %1145 = vmatpush3.msra.mxu1 %v485_v18 }
  0x26   : > { %1101 = vmatprep.subr.mxu0 %v1388_v1  ;;  %1146 = vmatprep.subr.mxu1 %v1388_v1 }
  0x27   : > { %1102 = vmatpush3.msra.mxu0 %v369_v17  ;;  %1147 = vmatpush3.msra.mxu1 %v484_v20 }
  0x28   : > { %1103 = vmatprep.subr.mxu0 %v1388_v1  ;;  %1148 = vmatprep.subr.mxu1 %v1388_v1 }
  0x29   : > { %1104 = vmatpush3.msra.mxu0 %v368_v19  ;;  %1149 = vmatpush3.msra.mxu1 %v483_v31  ;;  %v738_v31 = vld [vmem:[%s1841_s7 + $0x8] sm:$0xff] }
  0x2a   : > { %1105 = vmatprep.subr.mxu0 %v1388_v1  ;;  %1150 = vmatprep.subr.mxu1 %v1388_v1 }
  0x2b   : > { %1106 = vmatpush3.msra.mxu0 %v367_v21  ;;  %1151 = vmatpush3.msra.mxu1 %v482_v32  ;;  %v737_v32 = vld [vmem:[%s1841_s7] sm:$0xff] }
  0x2c   : > { %1107 = vmatprep.subr.mxu0 %v1388_v1  ;;  %1152 = vmatprep.subr.mxu1 %v1388_v1 }
  0x2d   : > { %1108 = vmatpush3.msra.mxu0 %v366_v22  ;;  %1153 = vmatpush3.msra.mxu1 %v481_v33  ;;  %v990_v33 = vld [vmem:[%s1840_s6] ss:$0 sm:$0xff] }
  0x2e   : > { %1109 = vmatprep.subr.mxu0 %v1388_v1  ;;  %1169 = vmatprep.subr.mxu1 %v1388_v1 }
  0x2f   : > { %1110 = vmatpush3.msra.mxu0 %v365_v23 }
  0x30   : > { %1111 = vmatprep.subr.mxu0 %v1388_v1 }
  0x31   : > { %1112 = vmatpush3.msra.mxu0 %v364_v24 }
  0x32   : > { %1113 = vmatprep.subr.mxu0 %v1388_v1 }
  0x33   : > { %1114 = vmatpush3.msra.mxu0 %v363_v25 }
  0x34   : > { %1116 = vmatmul.mubr.f32.vlgmr.msra.gmra.mxu0 %v358_v26  ;;  %1200 = vmatprep.subr.mxu0 %v1388_v1 }
  0x35   : > { %1118 = vmatprep.mubr.msk.f32.mxu0 %vm1389_vm0, %v1388_v1  ;;  %1201 = vmatpush3.msra.mxu0 %v748_v63 }
  0x36   : > { %1202 = vmatprep.subr.mxu0 %v1388_v1 }
  0x37   : > { %1203 = vmatpush3.msra.mxu0 %v747_v0 }
  0x38   : > { %1119 = vmatmul.mubr.f32.gmra.mxu0 %v359_v27  ;;  %1204 = vmatprep.subr.mxu0 %v1388_v1 }
  0x39   : > { %1121 = vmatprep.mubr.msk.f32.mxu0 %vm1389_vm0, %v1388_v1  ;;  %1205 = vmatpush3.msra.mxu0 %v746_v2 }
  0x3a   : > { %1206 = vmatprep.subr.mxu0 %v1388_v1 }
  0x3b   : > { %1207 = vmatpush3.msra.mxu0 %v745_v3 }
  0x3c   : > { %1122 = vmatmul.mubr.f32.gmra.mxu0 %v360_v28  ;;  %1208 = vmatprep.subr.mxu0 %v1388_v1 }
  0x3d   : > { %1124 = vmatprep.mubr.msk.f32.mxu0 %vm1389_vm0, %v1388_v1  ;;  %1209 = vmatpush3.msra.mxu0 %v744_v4 }
  0x3e   : > { %1210 = vmatprep.subr.mxu0 %v1388_v1 }
  0x3f   : > { %1211 = vmatpush3.msra.mxu0 %v743_v5 }
  0x40   : > { %1125 = vmatmul.mubr.f32.gmra.mxu0 %v361_v29  ;;  %1212 = vmatprep.subr.mxu0 %v1388_v1 }
  0x41   : > { %1127 = vmatprep.mubr.msk.f32.mxu0 %vm1389_vm0, %v1388_v1  ;;  %1213 = vmatpush3.msra.mxu0 %v742_v6 }
  0x42   : > { %1214 = vmatprep.subr.mxu0 %v1388_v1 }
  0x43   : > { %1215 = vmatpush3.msra.mxu0 %v741_v7 }
  0x44   : > { %1128 = vmatmul.mubr.f32.gmra.mxu0 %v362_v30  ;;  %1216 = vmatprep.subr.mxu0 %v1388_v1  ;;  %v739_v30 = vld [vmem:[%s1841_s7 + $0x10] sm:$0xff] }
  0x45   : > { %1224 = vmatprep.mubr.msk.f32.mxu0 %vm1389_vm0, %v1388_v1  ;;  %1217 = vmatpush3.msra.mxu0 %v740_v8 }
  0x46   : > { %1218 = vmatprep.subr.mxu0 %v1388_v1 }
  0x47   : > { %1219 = vmatpush3.msra.mxu0 %v739_v30 }
  0x48   : > { %1220 = vmatprep.subr.mxu0 %v1388_v1 }
  0x49   : > { %1221 = vmatpush3.msra.mxu0 %v738_v31 }
  0x4a   : > { %1222 = vmatprep.subr.mxu0 %v1388_v1 }
  0x4b   : > { %1223 = vmatpush3.msra.mxu0 %v737_v32 }
  0xf4   : > { %v452_v35 = vpop.f32.mrf.mxu0 }
  0xf5   : > { %v453_v36 = vadd.f32 %v983_v34, %v452_v35 }
  0xf6   : > { %v1117_v37 = vpop.f32.mrf.mxu0 }
  0xf7   : > { %v476_v38 = vmax.f32 %v453_v36, 0.0 }
  0xf8   : > { %v457_v40 = vpop.f32.mrf.mxu0 }
  0xf9   : > { %v458_v41 = vadd.f32 %v983_v34, %v457_v40  ;;  %1155 = vmatmul.mubr.msk.f32.vlgmr.msra.gmra.mxu1 %vm500_vm1, %v476_v38 }
  0xfa   : > { %v1120_v43 = vpop.f32.mrf.mxu0  ;;  %1157 = vmatprep.mubr.msk.f32.mxu1 %vm1389_vm0, %v1388_v1  ;;  %1170 = vmatpush3.msra.mxu1 %v618_v39 }
  0xfb   : > { %v477_v44 = vmax.f32 %v458_v41, 0.0  ;;  %1171 = vmatprep.subr.mxu1 %v1388_v1 }
  0xfc   : > { %v462_v46 = vpop.f32.mrf.mxu0  ;;  %1172 = vmatpush3.msra.mxu1 %v617_v42 }
  0xfd   : > { %v463_v47 = vadd.f32 %v983_v34, %v462_v46  ;;  %1158 = vmatmul.mubr.msk.f32.gmra.mxu1 %vm500_vm1, %v477_v44  ;;  %1173 = vmatprep.subr.mxu1 %v1388_v1 }
  0xfe   : > { %v1123_v49 = vpop.f32.mrf.mxu0  ;;  %1160 = vmatprep.mubr.msk.f32.mxu1 %vm1389_vm0, %v1388_v1  ;;  %1174 = vmatpush3.msra.mxu1 %v616_v45 }
  0xff   : > { %v478_v50 = vmax.f32 %v463_v47, 0.0  ;;  %1175 = vmatprep.subr.mxu1 %v1388_v1 }
 0x100   : > { %v467_v52 = vpop.f32.mrf.mxu0  ;;  %1176 = vmatpush3.msra.mxu1 %v615_v48 }
 0x101   : > { %v468_v53 = vadd.f32 %v983_v34, %v467_v52  ;;  %1161 = vmatmul.mubr.msk.f32.gmra.mxu1 %vm500_vm1, %v478_v50  ;;  %1177 = vmatprep.subr.mxu1 %v1388_v1 }
 0x102   : > { %v1126_v55 = vpop.f32.mrf.mxu0  ;;  %1163 = vmatprep.mubr.msk.f32.mxu1 %vm1389_vm0, %v1388_v1  ;;  %1178 = vmatpush3.msra.mxu1 %v614_v51 }
 0x103   : > { %v479_v56 = vmax.f32 %v468_v53, 0.0  ;;  %1179 = vmatprep.subr.mxu1 %v1388_v1 }
 0x104   : > { %v472_v57 = vpop.f32.mrf.mxu0  ;;  %1180 = vmatpush3.msra.mxu1 %v613_v54  ;;  %v996_v54 = vld [vmem:[%s1842_s8] ss:$0 sm:$0xff] }
 0x105   : > { %v473_v58 = vadd.f32 %v983_v34, %v472_v57  ;;  %1164 = vmatmul.mubr.msk.f32.gmra.mxu1 %vm500_vm1, %v479_v56  ;;  %1181 = vmatprep.subr.mxu1 %v1388_v1 }
 0x106   : > { %v1129_v59 = vpop.f32.mrf.mxu0  ;;  %1166 = vmatprep.mubr.msk.f32.mxu1 %vm1389_vm0, %v1388_v1  ;;  %1182 = vmatpush3.msra.mxu1 %v612_v61 }
 0x107   : > { %v480_v60 = vmax.f32 %v473_v58, 0.0  ;;  %1183 = vmatprep.subr.mxu1 %v1388_v1 }
 0x108   : > { %1184 = vmatpush3.msra.mxu1 %v611_v62 }
 0x109   : > { %1167 = vmatmul.mubr.msk.f32.gmra.mxu1 %vm500_vm1, %v480_v60  ;;  %1239 = vmatprep.subr.mxu1 %v1388_v1 }
 0x10a   : > { %1185 = vmatprep.mubr.msk.f32.mxu1 %vm1389_vm0, %v1388_v1 }
 0x1b9   : > { %v582_v10 = vpop.f32.mrf.mxu1 }
 0x1ba   : > { %v583_v11 = vadd.f32 %v984_v9, %v582_v10 }
 0x1bb   : > { %v1156_v12 = vpop.f32.mrf.mxu1 }
 0x1bc   : > { %v606_v13 = vmax.f32 %v583_v11, 0.0 }
 0x1bd   : > { %v587_v14 = vpop.f32.mrf.mxu1 }
 0x1be   : > { %v588_v15 = vadd.f32 %v984_v9, %v587_v14  ;;  %1186 = vmatmul.mubr.msk.f32.vlgmr.msra.gmra.mxu1 %vm626_vm2, %v606_v13 }
 0x1bf   : > { %v1159_v16 = vpop.f32.mrf.mxu1  ;;  %1188 = vmatprep.mubr.msk.f32.mxu1 %vm1389_vm0, %v1388_v1  ;;  %1251 = vmatpush3.msra.mxu1 %v748_v63 }
 0x1c0   : > { %v607_v17 = vmax.f32 %v588_v15, 0.0  ;;  %1240 = vmatprep.subr.mxu1 %v1388_v1 }
 0x1c1   : > { %v592_v18 = vpop.f32.mrf.mxu1  ;;  %1252 = vmatpush3.msra.mxu1 %v747_v0 }
 0x1c2   : > { %v593_v19 = vadd.f32 %v984_v9, %v592_v18  ;;  %1189 = vmatmul.mubr.msk.f32.gmra.mxu1 %vm626_vm2, %v607_v17  ;;  %1241 = vmatprep.subr.mxu1 %v1388_v1 }
 0x1c3   : > { %v1162_v20 = vpop.f32.mrf.mxu1  ;;  %1191 = vmatprep.mubr.msk.f32.mxu1 %vm1389_vm0, %v1388_v1  ;;  %1253 = vmatpush3.msra.mxu1 %v746_v2 }
 0x1c4   : > { %v608_v21 = vmax.f32 %v593_v19, 0.0  ;;  %1242 = vmatprep.subr.mxu1 %v1388_v1 }
 0x1c5   : > { %v597_v22 = vpop.f32.mrf.mxu1  ;;  %1254 = vmatpush3.msra.mxu1 %v745_v3 }
 0x1c6   : > { %v598_v23 = vadd.f32 %v984_v9, %v597_v22  ;;  %1192 = vmatmul.mubr.msk.f32.gmra.mxu1 %vm626_vm2, %v608_v21  ;;  %1243 = vmatprep.subr.mxu1 %v1388_v1 }
 0x1c7   : > { %v1165_v24 = vpop.f32.mrf.mxu1  ;;  %1194 = vmatprep.mubr.msk.f32.mxu1 %vm1389_vm0, %v1388_v1  ;;  %1255 = vmatpush3.msra.mxu1 %v744_v4 }
 0x1c8   : > { %v609_v25 = vmax.f32 %v598_v23, 0.0  ;;  %1244 = vmatprep.subr.mxu1 %v1388_v1 }
 0x1c9   : > { %v602_v26 = vpop.f32.mrf.mxu1  ;;  %1256 = vmatpush3.msra.mxu1 %v743_v5 }
 0x1ca   : > { %v603_v27 = vadd.f32 %v984_v9, %v602_v26  ;;  %1195 = vmatmul.mubr.msk.f32.gmra.mxu1 %vm626_vm2, %v609_v25  ;;  %1245 = vmatprep.subr.mxu1 %v1388_v1 }
 0x1cb   : > { %v1168_v28 = vpop.f32.mrf.mxu1  ;;  %1197 = vmatprep.mubr.msk.f32.mxu1 %vm1389_vm0, %v1388_v1  ;;  %1257 = vmatpush3.msra.mxu1 %v742_v6 }
 0x1cc   : > { %v610_v29 = vmax.f32 %v603_v27, 0.0  ;;  %1246 = vmatprep.subr.mxu1 %v1388_v1 }
 0x1cd   : > { %1258 = vmatpush3.msra.mxu1 %v741_v7 }
 0x1ce   : > { %1198 = vmatmul.mubr.msk.f32.gmra.mxu1 %vm626_vm2, %v610_v29  ;;  %1247 = vmatprep.subr.mxu1 %v1388_v1 }
 0x1cf   : > { %1259 = vmatpush3.msra.mxu1 %v740_v8  ;;  %1236 = vmatprep.mubr.msk.f32.mxu1 %vm1389_vm0, %v1388_v1 }
 0x1d0   : > { %1248 = vmatprep.subr.mxu1 %v1388_v1 }
 0x1d1   : > { %1260 = vmatpush3.msra.mxu1 %v739_v30 }
 0x1d2   : > { %1249 = vmatprep.subr.mxu1 %v1388_v1 }
 0x1d3   : > { %1261 = vmatpush3.msra.mxu1 %v738_v31 }
 0x1d4   : > { %1250 = vmatprep.subr.mxu1 %v1388_v1 }
 0x1d5   : > { %1262 = vmatpush3.msra.mxu1 %v737_v32 }
 0x27e   : > { %v708_v34 = vpop.f32.mrf.mxu1 }
 0x27f   : > { %v709_v35 = vadd.f32 %v990_v33, %v708_v34 }
 0x280   : > { %v1187_v36 = vpop.f32.mrf.mxu1 }
 0x281   : > { %v732_v37 = vmax.f32 %v709_v35, 0.0 }
 0x282   : > { %v713_v38 = vpop.f32.mrf.mxu1 }
 0x283   : > { %v714_v39 = vadd.f32 %v990_v33, %v713_v38  ;;  %1225 = vmatmul.mubr.msk.f32.vlgmr.msra.gmra.mxu0 %vm500_vm1, %v732_v37 }
 0x284   : > { %v1190_v40 = vpop.f32.mrf.mxu1  ;;  %1227 = vmatprep.mubr.msk.f32.mxu0 %vm1389_vm0, %v1388_v1 }
 0x285   : > { %v733_v41 = vmax.f32 %v714_v39, 0.0 }
 0x286   : > { %v718_v42 = vpop.f32.mrf.mxu1 }
 0x287   : > { %v719_v43 = vadd.f32 %v990_v33, %v718_v42  ;;  %1228 = vmatmul.mubr.msk.f32.gmra.mxu0 %vm500_vm1, %v733_v41 }
 0x288   : > { %v1193_v44 = vpop.f32.mrf.mxu1  ;;  %1230 = vmatprep.mubr.msk.f32.mxu0 %vm1389_vm0, %v1388_v1 }
 0x289   : > { %v734_v45 = vmax.f32 %v719_v43, 0.0 }
 0x28a   : > { %v723_v46 = vpop.f32.mrf.mxu1 }
 0x28b   : > { %v724_v47 = vadd.f32 %v990_v33, %v723_v46  ;;  %1231 = vmatmul.mubr.msk.f32.gmra.mxu0 %vm500_vm1, %v734_v45 }
 0x28c   : > { %v1196_v48 = vpop.f32.mrf.mxu1  ;;  %1233 = vmatprep.mubr.msk.f32.mxu0 %vm1389_vm0, %v1388_v1 }
 0x28d   : > { %v735_v49 = vmax.f32 %v724_v47, 0.0 }
 0x28e   : > { %v728_v50 = vpop.f32.mrf.mxu1 }
 0x28f   : > { %v729_v51 = vadd.f32 %v990_v33, %v728_v50  ;;  %1234 = vmatmul.mubr.msk.f32.gmra.mxu0 %vm500_vm1, %v735_v49 }
 0x290   : > { %v1199_v52 = vpop.f32.mrf.mxu1 }
 0x291   : > { %v736_v53 = vmax.f32 %v729_v51, 0.0 }
 0x293   : > { %1237 = vmatmul.mubr.msk.f32.vlgmr.msra.gmra.mxu1 %vm500_vm1, %v736_v53 }
 0x343   : > { %v837_v55 = vpop.f32.mrf.mxu0 }
 0x344   : > { %v838_v56 = vadd.f32 %v996_v54, %v837_v55 }
 0x345   : > { %v1226_v57 = vpop.f32.mrf.mxu0 }
 0x346   : > { %v1002_v58 = vmul.f32 -1.442695, %v838_v56 }
 0x347   : > { %v842_v59 = vpop.f32.mrf.mxu0 }
 0x348   : > { %1306 = vpow2.f32 %v1002_v58  ;;  %v843_v1 = vadd.f32 %v996_v54, %v842_v59 }
 0x349   : > { %v1229_v60 = vpop.f32.mrf.mxu0 }
 0x34a   : > { %v1003_v61 = vmul.f32 -1.442695, %v843_v1 }
 0x34b   : > { %v847_v62 = vpop.f32.mrf.mxu0 }
 0x34c   : > { %1308 = vpow2.f32 %v1003_v61  ;;  %v848_v63 = vadd.f32 %v996_v54, %v847_v62 }
 0x34d   : > { %v1232_v0 = vpop.f32.mrf.mxu0 }
 0x34e   : > { %v1004_v2 = vmul.f32 -1.442695, %v848_v63 }
 0x34f   : > { %v852_v3 = vpop.f32.mrf.mxu0 }
 0x350   : > { %1310 = vpow2.f32 %v1004_v2  ;;  %v853_v4 = vadd.f32 %v996_v54, %v852_v3 }
 0x351   : > { %v1235_v5 = vpop.f32.mrf.mxu0 }
 0x352   : > { %v1005_v6 = vmul.f32 -1.442695, %v853_v4 }
 0x353   : > { %v857_v7 = vpop.f32.mrf.mxu1 }
 0x354   : > { %1312 = vpow2.f32 %v1005_v6  ;;  %v858_v8 = vadd.f32 %v996_v54, %v857_v7 }
 0x355   : > { %v1307_v9 = vpop.eup %1306  ;;  %v1238_v10 = vpop.f32.mrf.mxu1 }
 0x356   : > { %v876_v11 = vadd.f32 1.0, %v1307_v9  ;;  %v1006_v12 = vmul.f32 -1.442695, %v858_v8 }
 0x358   : > { %1314 = vrcp.f32 %v876_v11 }
 0x359   : > { %v1309_v13 = vpop.eup %1308  ;;  %1316 = vpow2.f32 %v1006_v12 }
 0x35a   : > { %v877_v14 = vadd.f32 1.0, %v1309_v13 }
 0x35c   : > { %1318 = vrcp.f32 %v877_v14 }
 0x35d   : > { %v1311_v15 = vpop.eup %1310 }
 0x35e   : > { %v878_v16 = vadd.f32 1.0, %v1311_v15 }
 0x360   : > { %1320 = vrcp.f32 %v878_v16 }
 0x361   : > { %v1313_v17 = vpop.eup %1312 }
 0x362   : > { %v879_v18 = vadd.f32 1.0, %v1313_v17 }
 0x364   : > { %1322 = vrcp.f32 %v879_v18 }
 0x365   : > { %v1315_v19 = vpop.eup %1314 }
 0x366   : > { %v1317_v20 = vpop.eup %1316  ;;  %891 = vst [vmem:[%s338_s17] sm:$0xff] %v1315_v19 }
 0x367   : > { %v880_v21 = vadd.f32 1.0, %v1317_v20 }
 0x369   : > { %v1319_v22 = vpop.eup %1318  ;;  %1324 = vrcp.f32 %v880_v21 }
 0x36a   : > { %892 = vst [vmem:[%s338_s17 + $0x8] sm:$0xff] %v1319_v22 }
 0x36d   : > { %v1321_v23 = vpop.eup %1320 }
 0x36e   : > { %893 = vst [vmem:[%s338_s17 + $0x10] sm:$0xff] %v1321_v23 }
 0x371   : > { %v1323_v24 = vpop.eup %1322 }
 0x372   : > { %894 = vst [vmem:[%s338_s17 + $0x18] sm:$0xff] %v1323_v24 }
 0x373   : > { %903 = sbr.rel (!%p1481_p5) target bundleno = 915 (0x393), region = 60 }
 0x376   : > { %v1325_v25 = vpop.eup %1324 }
 0x377   : > { %895 = vst [vmem:[%s338_s17 + $0x20] sm:$0xff] %v1325_v25 }
 0x378   : > { %s1851_s23 = smov (!%p906_p11, %s905_s23), 5 }
 0x379   : > { %s1780_s24 = sshll.u32 %s1851_s23, 7 }
 0x37a   : > { %s910_s25 = ssub.s32 640, %s1780_s24 }
 0x37b   : > { %911 = vsyncadd %s1775_s22, %s910_s25  ;;  %p1008_p12 = scmp.ne.s32.totalorder %s1780_s24, 0  ;;  %s1014_s26 = smul.u32 640, %s1464_s13 }
 0x37c   : > { %s916_s28 = sshll.u32 %s338_s17, 4  ;;  %s1390_s14 = smov [#allocation2]   ;;  %s1791_s28 = int_to_ptr.vmem [resolvable:$true] %s916_s28 }
 0x37d   : > { %s1789_s27 = scalar_lea.hbm %s1843_s9, %s1014_s26  ;;  %s1326_s21 = scalar_lea.vmem %s1791_s28, %s1780_s24 }
 0x37e   : > { %p1327_p13 = scmp.ne.s32.totalorder %s1791_s28, %s1326_s21  ;;  %s1330_s16 = sshll.u32 %s1390_s14, 4  ;;  %s1331_s16 = int_to_ptr.vmem [resolvable:$false] %s1330_s16 }
 0x37f   : > { %s1332_s13 = scalar_lea.vmem %s1331_s16, 1280  ;;  %p1333_p2 = scmp.lt.s32.totalorder %s1791_s28, %s1331_s16 }
 0x380   : > { %p1328_p0 = pnand %p1327_p13, %p1008_p12  ;;  %p1334_p3 = scmp.lt.s32.totalorder %s1332_s13, %s1326_s21 }
 0x382   : > { %p1329_p1 = pneg %p1328_p0  ;;  %p1335_p4 = por %p1334_p3, %p1333_p2 }
 0x384   : > { %p1336_p5 = pnand %p1335_p4, %p1329_p1 }
 0x386   : > { %1339 = shalt.err (!%p1336_p5)
}
 0x387   : > { %s1340_s17 = scalar_lea.hbm %s1789_s27, %s1780_s24  ;;  %s1344_s26 = scalar_lea.hbm %s1843_s9, 1152 }
 0x388   : > { %p1341_p7 = scmp.ne.s32.totalorder %s1789_s27, %s1340_s17  ;;  %p1345_p10 = scmp.lt.s32.totalorder %s1789_s27, %s1843_s9 }
 0x389   : > { %p1346_p11 = scmp.lt.s32.totalorder %s1344_s26, %s1340_s17 }
 0x38a   : > { %p1342_p8 = pnand %p1341_p7, %p1008_p12 }
 0x38b   : > { %p1347_p13 = por %p1346_p11, %p1345_p10 }
 0x38c   : > { %p1343_p9 = pneg %p1342_p8 }
 0x38e   : > { %p1348_p0 = pnand %p1347_p13, %p1343_p9 }
 0x390   : > { %1351 = shalt.err (!%p1348_p0)
}
 0x391   : > { %s1391_s21 = smov 128   ;;  %s1392_s14 = smov 8  }
 0x392   : > { %922 = dma.vmem_to_hbm [thread:$0]  (%p1008_p12), %s1791_s28, %s1780_s24, %s1789_s27, %s1775_s22, %s1391_s21, %s1391_s21, %s1392_s14  }
 0x393 PF: > { %p1269_p1 = scmp.ge.s32.totalorder %s1386_s12, 2  ;;  %s931_s16 = sand.u32 1, %s1374_s30  }
 0x394   : > { %s932_s13 = scalar_lea.sflag [#allocation3], %s931_s16 }
 0x395   : > { %p1266_p2 = pnand %p1269_p1, %p1485_p6 }
 0x397   : > { %p1267_p3 = pneg %p1266_p2 }
 0x399   : > { %1369 = dma.done.wait (%p1267_p3), %s932_s13, 640  }
 0x39a   : > { %1371 = vsyncadd (%p1267_p3), %s932_s13, 4294966656  ;;  %p19_p4 = scmp.ge.s32.totalorder %s1468_s15, 4   ;;  %s1846_s30 = smov %s1378_s10 }
 0x39b   : > { %s1847_s10 = smov %s1382_s11  ;;  %s1848_s11 = smov %s1479_s18 }
 0x39c   : > { %s1849_s12 = smov %s1468_s15  ;;  %21 = sbr.rel (!%p19_p4) target bundleno = 3 (0x3), region = 91 }
 0x3a1   :  { %937 = vsyncpa [#allocation3], 1 }
 0x3a2   :  { %939 = vsyncpa [#allocation3 + $0x1], 1 }

</bundles_post_ra>
